<compile_context>
chip_gen: v7x
topology: tpu7x:2x2x1
jax: 0.10.0
libtpu: 0.0.40
codegen_flags: <defaults>
</compile_context>

<pallas_src>
import collections
import functools

import jax
import jax.numpy as jnp
from jax.experimental import pallas as pl
from jax.experimental.pallas import tpu as pltpu


Dims = collections.namedtuple("Dims", ["bow", "hidden", "k", "k_pad", "length"])


def _round_up(x, m):
    return (x + m - 1) // m * m


def _log_softmax(x, axis):
    m = jnp.max(x, axis=axis, keepdims=True)
    s = x - m
    return s - jnp.log(jnp.sum(jnp.exp(s), axis=axis, keepdims=True))


# --------------------------------------------------------------------------- #
# Shared single-step math (used by both the single-step and the fused kernel) #
# --------------------------------------------------------------------------- #
def _unpack_weight_refs(refs, extra):
    if extra:
        wg, bg, attn, hij, wout, bout, wattn, battn = refs
    else:
        wg, bg, attn, hij, wout, bout = refs
        wattn = battn = None
    return wg, bg, attn, hij, wout, bout, wattn, battn


def _core(xh, c0, wrefs, dims, extra):
    """One decode step given xh = [x | h0] (B, BOW+H) f32 and c0 (B, H) f32."""
    (wg_ref, bg_ref, attn_ref, hij_ref, wout_ref, bout_ref,
     wattn_ref, battn_ref) = wrefs
    H, K, K_pad, L = dims.hidden, dims.k, dims.k_pad, dims.length
    KL = K * L
    f32 = jnp.float32
    cd = wg_ref.dtype          # MXU operand dtype (f32, or bf16 on v6e/v7x)

    # ---- LSTM cell: ONE fused gate matmul (PyTorch gate order i, f, g, o) ---
    gates = (jnp.dot(xh.astype(cd), wg_ref[...], preferred_element_type=f32)
             + bg_ref[...])                                          # (B, 4H)
    i_g = jax.nn.sigmoid(gates[:, 0 * H:1 * H])
    f_g = jax.nn.sigmoid(gates[:, 1 * H:2 * H])
    g_g = jnp.tanh(gates[:, 2 * H:3 * H])
    o_g = jax.nn.sigmoid(gates[:, 3 * H:4 * H])
    c1 = f_g * c0 + i_g * g_g                                        # f32 state
    h1 = o_g * jnp.tanh(c1)

    # ---- hierarchical attention: ONE fused score matmul ---------------------
    # attn_ref = [hs^T | pad | hij^T] with the decode rows pre-zeroed, so no
    # iota mask of h1 and no transposed contraction is needed.
    scores = jnp.dot(h1.astype(cd), attn_ref[...],
                     preferred_element_type=f32)                     # (B, Kp+KL)
    a_sc = scores[:, :K]                                             # (B, K)
    b_sc = scores[:, K_pad:]                                         # (B, KL)

    # softmax over the K summaries (EUP reciprocal, off the VALU)
    a_e = jnp.exp(a_sc - jnp.max(a_sc, axis=1, keepdims=True))
    a = a_e * pl.reciprocal(jnp.sum(a_e, axis=1, keepdims=True), approx=True)

    # per-group softmax over word positions + combine with summary weights via
    # one-hot group matrices on the MXU.  The one-hots are built from iota
    # (no integer div, no extra input DMAs).  Subtracting the global row max
    # is exact: the per-group normalization cancels the constant factor.
    b_e = jnp.exp(b_sc - jnp.max(b_sc, axis=1, keepdims=True))       # (B, KL)
    n_r = jax.lax.broadcasted_iota(jnp.int32, (KL, K), 0)
    k_r = jax.lax.broadcasted_iota(jnp.int32, (KL, K), 1)
    g_red = ((n_r >= k_r * L) & (n_r < (k_r + 1) * L)).astype(cd)    # (KL, K)
    k_e = jax.lax.broadcasted_iota(jnp.int32, (K, KL), 0)
    n_e = jax.lax.broadcasted_iota(jnp.int32, (K, KL), 1)
    g_exp = ((n_e >= k_e * L) & (n_e < (k_e + 1) * L)).astype(cd)    # (K, KL)

    g_sums = jnp.dot(b_e.astype(cd), g_red, preferred_element_type=f32)
    # clamp: if a whole group underflowed against the global row max, stay
    # finite (0 * huge = 0) instead of producing inf/NaN.
    scale_k = a * pl.reciprocal(jnp.maximum(g_sums, 1e-30), approx=True)
    ab = b_e * jnp.dot(scale_k.astype(cd), g_exp, preferred_element_type=f32)

    if extra:
        ab = (jnp.dot(ab.astype(cd), wattn_ref[...],
                      preferred_element_type=f32) + battn_ref[...])

    # ---- decode + output projection + log-softmax ----------------------------
    # Full-H contraction: w_out's attention-dim rows are zero, and the padded
    # vocab lanes carry a -1e30 bias so they drop out of the log-softmax.
    cvec = jnp.dot(ab.astype(cd), hij_ref[...], preferred_element_type=f32)
    logits = (jnp.dot(cvec.astype(cd), wout_ref[...],
                      preferred_element_type=f32) + bout_ref[...])   # (B, Vpad)
    logp = _log_softmax(logits, axis=1)
    return logp, h1, c1, ab


def _pack_state(h1, c1, ab, slab_width):
    parts = [h1, c1, ab]
    used = h1.shape[1] + c1.shape[1] + ab.shape[1]
    if slab_width > used:
        parts.append(jnp.zeros((h1.shape[0], slab_width - used), jnp.float32))
    return jnp.concatenate(parts, axis=1)


# --------------------------------------------------------------------------- #
# Kernels                                                                     #
# --------------------------------------------------------------------------- #
def _step_kernel(dims, extra, *refs):
    xhc_ref = refs[0]
    out_ref, state_ref = refs[-2], refs[-1]
    wrefs = _unpack_weight_refs(refs[1:-2], extra)

    split = dims.bow + dims.hidden
    xh = xhc_ref[:, :split]                 # [x | h0]
    c0 = xhc_ref[:, split:]                 # c0

    logp, h1, c1, ab = _core(xh, c0, wrefs, dims, extra)
    out_ref[...] = logp
    state_ref[...] = _pack_state(h1, c1, ab, state_ref.shape[1])


def _loop_kernel(dims, extra, *refs):
    x_ref, hc0_ref = refs[0], refs[1]
    hc_ref = refs[-1]                       # VMEM scratch carry (B, 2H)
    out_ref, state_ref = refs[-3], refs[-2]
    wrefs = _unpack_weight_refs(refs[2:-3], extra)
    H = dims.hidden
    t = pl.program_id(0)

    @pl.when(t == 0)
    def _init():
        hc_ref[...] = hc0_ref[...]

    h0 = hc_ref[:, :H]
    c0 = hc_ref[:, H:]
    xh = jnp.concatenate([x_ref[0], h0], axis=1)

    logp, h1, c1, ab = _core(xh, c0, wrefs, dims, extra)
    out_ref[0] = logp
    state_ref[0] = _pack_state(h1, c1, ab, state_ref.shape[2])
    hc_ref[...] = jnp.concatenate([h1, c1], axis=1)


# --------------------------------------------------------------------------- #
# One-time weight / encoder repacking                                         #
# --------------------------------------------------------------------------- #
def pack_params(params, *, K, max_word_length, attention_dims,
                mxu_dtype=jnp.float32):
    """Repack PyTorch-layout weights into MXU-friendly layouts (done once)."""
    del K, max_word_length
    BOW, H4 = params["w_ih_t"].shape
    H = H4 // 4
    SD = H - attention_dims
    V = params["w_out_t"].shape[1]
    V_pad = _round_up(V, 128)

    # fused LSTM gate weight: [x | h] -> 4H in ONE matmul
    w_gates = jnp.concatenate([params["w_ih_t"], params["w_hh_t"]],
                              axis=0).astype(mxu_dtype)              # (BOW+H,4H)
    # output projection: zero rows over the attention dims, zero-padded vocab
    # columns, and a -1e30 bias on the padded vocab lanes.
    w_out = jnp.zeros((H, V_pad), jnp.float32)
    w_out = w_out.at[:SD, :V].set(params["w_out_t"]).astype(mxu_dtype)
    b_out = jnp.full((1, V_pad), -1e30, jnp.float32)
    b_out = b_out.at[:, :V].set(params["b_out"])

    return dict(
        embedding=params["embedding"],
        w_gates=w_gates,
        b_gates=params["b_gates"].astype(jnp.float32),   # b_ih + b_hh, (1, 4H)
        w_out=w_out,
        b_out=b_out,
        w_attn=params["w_attn_t"].astype(mxu_dtype),
        b_attn=params["b_attn"].astype(jnp.float32),
    )


def pack_encoder(encoder_out, *, K, max_word_length, attention_dims,
                 mxu_dtype=jnp.float32):
    """Per-document prep (amortized over all decode steps): hij flattened for
    the decode contraction + a single pre-transposed score operand
    [hs^T | pad | hij^T] with the decode rows zeroed."""
    hij, hs = encoder_out                     # (K, L, H), (K, H)
    H = hs.shape[-1]
    SD = H - attention_dims
    KL = K * max_word_length
    K_pad = _round_up(K, 8)
    hij_flat = hij.reshape(KL, H)
    attn_rows = (jnp.arange(H) >= SD)[:, None]
    hs_t = jnp.where(attn_rows, hs.T, 0.0)                           # (H, K)
    hij_t = jnp.where(attn_rows, hij_flat.T, 0.0)                    # (H, KL)
    attn_mat = jnp.concatenate(
        [hs_t, jnp.zeros((H, K_pad - K), hs.dtype), hij_t], axis=1)
    return dict(hij_flat=hij_flat.astype(mxu_dtype),
                attn_mat=attn_mat.astype(mxu_dtype))


# --------------------------------------------------------------------------- #
# Wrappers                                                                    #
# --------------------------------------------------------------------------- #
def hier_attn_decoder(packed, encoder_out, context_ids, lstm_hidden, *,
                      vocab_size, K, max_word_length, attention_dims,
                      extra_attn_linear):
    """Single decode step; mirrors HierAttnDecoder.forward.
    Returns (log_probs (B,V), (h1 (1,B,H), c1 (1,B,H)), ab (B,K*L,1))."""
    h0, c0 = lstm_hidden
    B = context_ids.shape[0]
    H = h0.shape[-1]
    BOW = packed["embedding"].shape[1]
    L = max_word_length
    KL = K * L
    K_pad = _round_up(K, 8)
    V = vocab_size
    V_pad = packed["w_out"].shape[1]
    S_pad = _round_up(2 * H + KL, 128)
    cd = packed["w_gates"].dtype

    enc = pack_encoder(encoder_out, K=K, max_word_length=L,
                       attention_dims=attention_dims, mxu_dtype=cd)

    # glue: embedding gather + single lane-packed activation slab [x | h0 | c0]
    # TODO(synk): dropout(p=0.1) treated as eval-mode identity (no RNG mask).
    x = packed["embedding"][context_ids]                             # (B, BOW)
    xhc = jnp.concatenate([x, h0[0], c0[0]], axis=1)                 # (B,BOW+2H)

    dims = Dims(bow=BOW, hidden=H, k=K, k_pad=K_pad, length=L)
    args = [xhc, packed["w_gates"], packed["b_gates"],
            enc["attn_mat"], enc["hij_flat"], packed["w_out"], packed["b_out"]]
    if extra_attn_linear:
        args += [packed["w_attn"], packed["b_attn"]]

    vmem = pl.BlockSpec(memory_space=pltpu.MemorySpace.VMEM)
    out_pad, state = pl.pallas_call(
        functools.partial(_step_kernel, dims, extra_attn_linear),
        out_shape=(jax.ShapeDtypeStruct((B, V_pad), jnp.float32),
                   jax.ShapeDtypeStruct((B, S_pad), jnp.float32)),
        in_specs=[vmem] * len(args),
        out_specs=(vmem, vmem),
    )(*args)

    out = out_pad[:, :V]
    h1 = state[:, :H]
    c1 = state[:, H:2 * H]
    ab = state[:, 2 * H:2 * H + KL]
    return out, (h1[None], c1[None]), ab[:, :, None]


def hier_attn_decoder_fused(packed, encoder_out, context_ids_seq, lstm_hidden, *,
                            vocab_size, K, max_word_length, attention_dims,
                            extra_attn_linear):
    """T teacher-forced decode steps fused into ONE pallas_call (grid over
    steps): weights + encoder tensors are VMEM-resident (constant index_maps),
    the LSTM state is carried in VMEM scratch, and per-step log-probs /
    (h, c, ab) slabs are streamed out.  Equivalent to calling
    `hier_attn_decoder` T times with the state threaded through."""
    h0, c0 = lstm_hidden
    T, B = context_ids_seq.shape
    H = h0.shape[-1]
    BOW = packed["embedding"].shape[1]
    L = max_word_length
    KL = K * L
    K_pad = _round_up(K, 8)
    V = vocab_size
    V_pad = packed["w_out"].shape[1]
    S_pad = _round_up(2 * H + KL, 128)
    cd = packed["w_gates"].dtype

    enc = pack_encoder(encoder_out, K=K, max_word_length=L,
                       attention_dims=attention_dims, mxu_dtype=cd)

    # TODO(synk): dropout(p=0.1) treated as eval-mode identity (no RNG mask).
    x_seq = packed["embedding"][context_ids_seq]                     # (T,B,BOW)
    hc0 = jnp.concatenate([h0[0], c0[0]], axis=1)                    # (B, 2H)

    dims = Dims(bow=BOW, hidden=H, k=K, k_pad=K_pad, length=L)
    weights = [packed["w_gates"], packed["b_gates"], enc["attn_mat"],
               enc["hij_flat"], packed["w_out"], packed["b_out"]]
    if extra_attn_linear:
        weights += [packed["w_attn"], packed["b_attn"]]

    def resident(a):                      # full block, fetched once (index 0,0)
        nd = a.ndim
        return pl.BlockSpec(a.shape, lambda t: (0,) * nd)

    in_specs = ([pl.BlockSpec((1, B, BOW), lambda t: (t, 0, 0)),
                 pl.BlockSpec((B, 2 * H), lambda t: (0, 0))]
                + [resident(w) for w in weights])
    out_specs = (pl.BlockSpec((1, B, V_pad), lambda t: (t, 0, 0)),
                 pl.BlockSpec((1, B, S_pad), lambda t: (t, 0, 0)))

    out_seq_pad, state_seq = pl.pallas_call(
        functools.partial(_loop_kernel, dims, extra_attn_linear),
        grid=(T,),
        out_shape=(jax.ShapeDtypeStruct((T, B, V_pad), jnp.float32),
                   jax.ShapeDtypeStruct((T, B, S_pad), jnp.float32)),
        in_specs=in_specs,
        out_specs=out_specs,
        scratch_shapes=[pltpu.VMEM((B, 2 * H), jnp.float32)],
        compiler_params=pltpu.CompilerParams(
            dimension_semantics=("arbitrary",)),      # sequential state carry
    )(x_seq, hc0, *weights)

    out_seq = out_seq_pad[:, :, :V]
    h_seq = state_seq[:, :, :H]
    c_seq = state_seq[:, :, H:2 * H]
    ab_seq = state_seq[:, :, 2 * H:2 * H + KL]
    return out_seq, (h_seq[-1][None], c_seq[-1][None]), ab_seq[..., None]


# --------------------------------------------------------------------------- #
# Pure-JAX reference (mirrors the PyTorch forward)                            #
# --------------------------------------------------------------------------- #
def reference(params, hij, hs, context_ids, h0, c0, *, K, L, A, extra):
    B = context_ids.shape[0]
    H = h0.shape[-1]
    SD = H - A
    x = params["embedding"][context_ids]
    gates = x @ params["w_ih_t"] + h0[0] @ params["w_hh_t"] + params["b_gates"]
    i = jax.nn.sigmoid(gates[:, :H])
    f = jax.nn.sigmoid(gates[:, H:2 * H])
    g = jnp.tanh(gates[:, 2 * H:3 * H])
    o = jax.nn.sigmoid(gates[:, 3 * H:4 * H])
    c1 = f * c0[0] + i * g
    h1 = o * jnp.tanh(c1)
    hij_c = jnp.broadcast_to(hij[None], (B, K, L, H)).reshape(B, K * L, H)
    decode = hij_c[:, :, :SD]
    attn_hij = hij_c[:, :, SD:]
    attn_yh = h1[:, SD:][:, :, None]
    attn_hs = jnp.broadcast_to(hs[None], (B, K, H))[:, :, SD:]
    a = jax.nn.softmax(jnp.einsum('bka,bao->bko', attn_hs, attn_yh), axis=1)
    b = jnp.einsum('bna,bao->bno', attn_hij, attn_yh).reshape(B, K, L)
    b = jax.nn.softmax(b, axis=2)
    ab = (a * b).reshape(B, K * L)
    if extra:
        ab = ab @ params["w_attn_t"] + params["b_attn"]
    ab3 = ab[:, :, None]
    cvec = jnp.sum(ab3 * decode, axis=1)
    out = jax.nn.log_softmax(cvec @ params["w_out_t"] + params["b_out"], axis=1)
    return out, h1, c1, ab3


def _check(name, got, want, rtol, atol):
    if not jnp.allclose(got, want, rtol=rtol, atol=atol):
        err = float(jnp.max(jnp.abs(got - want)))
        raise AssertionError(f"{name} mismatch (max abs err {err:.3e})")


if __name__ == "__main__":
    B, V, BOW, H = 2, 64, 32, 32
    A = 8                 # opt.attentionDims
    K, L = 4, 8           # opt.K, opt.maxWordLength
    T = 6                 # fused decode steps (teacher forced)
    EXTRA = True          # opt.extraAttnLinear
    SD = H - A

    key = jax.random.PRNGKey(0)
    ks = jax.random.split(key, 12)
    s = 0.1
    params = dict(
        embedding=jax.random.normal(ks[0], (V, BOW), jnp.float32) * s,
        w_ih_t=jax.random.normal(ks[1], (BOW, 4 * H), jnp.float32) * s,
        w_hh_t=jax.random.normal(ks[2], (H, 4 * H), jnp.float32) * s,
        b_gates=jax.random.normal(ks[3], (1, 4 * H), jnp.float32) * s,
        w_attn_t=jax.random.normal(ks[4], (K * L, K * L), jnp.float32) * s,
        b_attn=jax.random.normal(ks[5], (1, K * L), jnp.float32) * s,
        w_out_t=jax.random.normal(ks[6], (SD, V), jnp.float32) * s,
        b_out=jax.random.normal(ks[7], (1, V), jnp.float32) * s,
    )
    hij = jax.random.normal(ks[8], (K, L, H), jnp.float32)
    hidden_summaries = jax.random.normal(ks[9], (K, H), jnp.float32)
    context_seq = jax.random.randint(ks[10], (T, B), 0, V)
    h0 = jax.random.normal(ks[11], (1, B, H), jnp.float32) * s
    c0 = jnp.zeros((1, B, H), jnp.float32)

    common = dict(vocab_size=V, K=K, max_word_length=L,
                  attention_dims=A, extra_attn_linear=EXTRA)
    step_fn = jax.jit(functools.partial(hier_attn_decoder, **common))
    loop_fn = jax.jit(functools.partial(hier_attn_decoder_fused, **common))

    packed_f32 = pack_params(params, K=K, max_word_length=L, attention_dims=A,
                             mxu_dtype=jnp.float32)
    packed_bf16 = pack_params(params, K=K, max_word_length=L, attention_dims=A,
                              mxu_dtype=jnp.bfloat16)   # v6e/v7x MXU fast path

    # pure-JAX reference over the same T teacher-forced steps
    ref_out, ref_h, ref_c, ref_ab = [], [], [], []
    rh, rc = h0, c0
    for t in range(T):
        o_t, h_t, c_t, ab_t = reference(params, hij, hidden_summaries,
                                        context_seq[t], rh, rc,
                                        K=K, L=L, A=A, extra=EXTRA)
        ref_out.append(o_t); ref_h.append(h_t); ref_c.append(c_t); ref_ab.append(ab_t)
        rh, rc = h_t[None], c_t[None]
    ref_out = jnp.stack(ref_out); ref_h = jnp.stack(ref_h)
    ref_c = jnp.stack(ref_c); ref_ab = jnp.stack(ref_ab)

    # --- 1) single step, f32 MXU operands (tight check; out/ab tolerance floor
    #        is set by the approx EUP reciprocal) -----------------------------
    out1, (h1, c1), ab1 = step_fn(packed_f32, (hij, hidden_summaries),
                                  context_seq[0], (h0, c0))
    jax.block_until_ready((out1, h1, c1, ab1))
    _check("step.h1", h1[0], ref_h[0], rtol=1e-3, atol=1e-4)
    _check("step.c1", c1[0], ref_c[0], rtol=1e-3, atol=1e-4)
    _check("step.ab", ab1, ref_ab[0], rtol=1e-2, atol=2e-3)
    _check("step.out", out1, ref_out[0], rtol=1e-2, atol=3e-2)

    # --- 2) fused T-step decode, f32 -----------------------------------------
    outs, (hT, cT), abs_ = loop_fn(packed_f32, (hij, hidden_summaries),
                                   context_seq, (h0, c0))
    jax.block_until_ready(outs)
    _check("loop.hT", hT[0], ref_h[-1], rtol=1e-3, atol=2e-4)
    _check("loop.cT", cT[0], ref_c[-1], rtol=1e-3, atol=2e-4)
    _check("loop.ab", abs_, ref_ab, rtol=1e-2, atol=2e-3)
    _check("loop.out", outs, ref_out, rtol=1e-2, atol=3e-2)

    # --- 3) fused T-step decode, bf16 MXU operands (v6e/v7x) ------------------
    outs_b, (hT_b, cT_b), abs_b = loop_fn(packed_bf16, (hij, hidden_summaries),
                                          context_seq, (h0, c0))
    jax.block_until_ready(outs_b)
    _check("bf16.hT", hT_b[0], ref_h[-1], rtol=3e-2, atol=5e-3)
    _check("bf16.cT", cT_b[0], ref_c[-1], rtol=3e-2, atol=5e-3)
    _check("bf16.ab", abs_b, ref_ab, rtol=3e-2, atol=5e-3)
    _check("bf16.out", outs_b, ref_out, rtol=3e-2, atol=5e-2)

    print("KERNEL_OK")
</pallas_src>

<mosaic_0001>
module attributes {stable_mosaic.version = 11 : i64} {
  func.func @_step_kernel(%arg0: memref<2x96xf32, #tpu.memory_space<vmem>>, %arg1: memref<64x128xf32, #tpu.memory_space<vmem>>, %arg2: memref<1x128xf32, #tpu.memory_space<vmem>>, %arg3: memref<32x40xf32, #tpu.memory_space<vmem>>, %arg4: memref<32x32xf32, #tpu.memory_space<vmem>>, %arg5: memref<32x128xf32, #tpu.memory_space<vmem>>, %arg6: memref<1x128xf32, #tpu.memory_space<vmem>>, %arg7: memref<32x32xf32, #tpu.memory_space<vmem>>, %arg8: memref<1x32xf32, #tpu.memory_space<vmem>>, %arg9: memref<2x128xf32, #tpu.memory_space<vmem>>, %arg10: memref<2x128xf32, #tpu.memory_space<vmem>>) attributes {dimension_semantics = [], scalar_prefetch = 0 : i64, scratch_operands = 0 : i64, tpu.core_type = #tpu.core_type<tc>} {
    %c0 = arith.constant 0 : index
    %c0_0 = arith.constant 0 : index
    %0 = vector.load %arg0[%c0, %c0_0] : memref<2x96xf32, #tpu.memory_space<vmem>>, vector<2x64xf32>
    %c0_1 = arith.constant 0 : index
    %c64 = arith.constant 64 : index
    %1 = vector.load %arg0[%c0_1, %c64] : memref<2x96xf32, #tpu.memory_space<vmem>>, vector<2x32xf32>
    %c0_2 = arith.constant 0 : index
    %c0_3 = arith.constant 0 : index
    %2 = vector.load %arg1[%c0_2, %c0_3] : memref<64x128xf32, #tpu.memory_space<vmem>>, vector<64x128xf32>
    %cst = arith.constant dense<0.000000e+00> : vector<2x128xf32>
    %3 = tpu.matmul %0, %2, %cst {dimension_numbers = #tpu.dot_dimension_numbers<[1], [0], [0], [1], [0, 0, 1, 1], [], []>} : vector<2x64xf32>, vector<64x128xf32>, vector<2x128xf32> -> vector<2x128xf32>
    %c0_4 = arith.constant 0 : index
    %c0_5 = arith.constant 0 : index
    %4 = vector.load %arg2[%c0_4, %c0_5] : memref<1x128xf32, #tpu.memory_space<vmem>>, vector<1x128xf32>
    %5 = vector.broadcast %4 : vector<1x128xf32> to vector<2x128xf32>
    %6 = arith.addf %3, %5 : vector<2x128xf32>
    %7 = vector.extract_strided_slice %6 {offsets = [0, 0], sizes = [2, 32], strides = [1, 1]} : vector<2x128xf32> to vector<2x32xf32>
    %8 = arith.negf %7 : vector<2x32xf32>
    %9 = math.exp %8 : vector<2x32xf32>
    %cst_6 = arith.constant 1.000000e+00 : f32
    %10 = vector.broadcast %cst_6 : f32 to vector<2x32xf32>
    %11 = arith.addf %10, %9 : vector<2x32xf32>
    %12 = arith.divf %10, %11 : vector<2x32xf32>
    %13 = vector.extract_strided_slice %6 {offsets = [0, 32], sizes = [2, 32], strides = [1, 1]} : vector<2x128xf32> to vector<2x32xf32>
    %14 = arith.negf %13 : vector<2x32xf32>
    %15 = math.exp %14 : vector<2x32xf32>
    %cst_7 = arith.constant 1.000000e+00 : f32
    %16 = vector.broadcast %cst_7 : f32 to vector<2x32xf32>
    %17 = arith.addf %16, %15 : vector<2x32xf32>
    %18 = arith.divf %16, %17 : vector<2x32xf32>
    %19 = vector.extract_strided_slice %6 {offsets = [0, 64], sizes = [2, 32], strides = [1, 1]} : vector<2x128xf32> to vector<2x32xf32>
    %20 = math.tanh %19 : vector<2x32xf32>
    %21 = vector.extract_strided_slice %6 {offsets = [0, 96], sizes = [2, 32], strides = [1, 1]} : vector<2x128xf32> to vector<2x32xf32>
    %22 = arith.negf %21 : vector<2x32xf32>
    %23 = math.exp %22 : vector<2x32xf32>
    %cst_8 = arith.constant 1.000000e+00 : f32
    %24 = vector.broadcast %cst_8 : f32 to vector<2x32xf32>
    %25 = arith.addf %24, %23 : vector<2x32xf32>
    %26 = arith.divf %24, %25 : vector<2x32xf32>
    %27 = arith.mulf %18, %1 : vector<2x32xf32>
    %28 = arith.mulf %12, %20 : vector<2x32xf32>
    %29 = arith.addf %27, %28 : vector<2x32xf32>
    %30 = math.tanh %29 : vector<2x32xf32>
    %31 = arith.mulf %26, %30 : vector<2x32xf32>
    %c0_9 = arith.constant 0 : index
    %c0_10 = arith.constant 0 : index
    %32 = vector.load %arg3[%c0_9, %c0_10] : memref<32x40xf32, #tpu.memory_space<vmem>>, vector<32x40xf32>
    %cst_11 = arith.constant dense<0.000000e+00> : vector<2x40xf32>
    %33 = tpu.matmul %31, %32, %cst_11 {dimension_numbers = #tpu.dot_dimension_numbers<[1], [0], [0], [1], [0, 0, 1, 1], [], []>} : vector<2x32xf32>, vector<32x40xf32>, vector<2x40xf32> -> vector<2x40xf32>
    %34 = vector.extract_strided_slice %33 {offsets = [0, 0], sizes = [2, 4], strides = [1, 1]} : vector<2x40xf32> to vector<2x4xf32>
    %35 = vector.extract_strided_slice %33 {offsets = [0, 8], sizes = [2, 32], strides = [1, 1]} : vector<2x40xf32> to vector<2x32xf32>
    %cst_12 = arith.constant dense<0xFF800000> : vector<2xf32>
    %36 = vector.multi_reduction <maximumf>, %34, %cst_12 [1] : vector<2x4xf32> to vector<2xf32>
    %37 = vector.shape_cast %36 : vector<2xf32> to vector<2x1xf32>
    %38 = vector.broadcast %37 : vector<2x1xf32> to vector<2x4xf32>
    %39 = arith.subf %34, %38 : vector<2x4xf32>
    %40 = math.exp %39 : vector<2x4xf32>
    %cst_13 = arith.constant dense<0.000000e+00> : vector<2xf32>
    %41 = vector.multi_reduction <add>, %40, %cst_13 [1] : vector<2x4xf32> to vector<2xf32>
    %42 = vector.shape_cast %41 : vector<2xf32> to vector<2x1xf32>
    %43 = tpu.reciprocal %42 {approx = true} : vector<2x1xf32> -> vector<2x1xf32>
    %44 = vector.broadcast %43 : vector<2x1xf32> to vector<2x4xf32>
    %45 = arith.mulf %40, %44 : vector<2x4xf32>
    %cst_14 = arith.constant dense<0xFF800000> : vector<2xf32>
    %46 = vector.multi_reduction <maximumf>, %35, %cst_14 [1] : vector<2x32xf32> to vector<2xf32>
    %47 = vector.shape_cast %46 : vector<2xf32> to vector<2x1xf32>
    %48 = vector.broadcast %47 : vector<2x1xf32> to vector<2x32xf32>
    %49 = arith.subf %35, %48 : vector<2x32xf32>
    %50 = math.exp %49 : vector<2x32xf32>
    %51 = tpu.iota {dimensions = array<i32: 0>} : vector<32x4xi32>
    %52 = tpu.iota {dimensions = array<i32: 1>} : vector<32x4xi32>
    %c8_i32 = arith.constant 8 : i32
    %53 = vector.broadcast %c8_i32 : i32 to vector<32x4xi32>
    %54 = arith.muli %52, %53 : vector<32x4xi32>
    %55 = arith.cmpi sge, %51, %54 : vector<32x4xi32>
    %c1_i32 = arith.constant 1 : i32
    %56 = vector.broadcast %c1_i32 : i32 to vector<32x4xi32>
    %57 = arith.addi %52, %56 : vector<32x4xi32>
    %c8_i32_15 = arith.constant 8 : i32
    %58 = vector.broadcast %c8_i32_15 : i32 to vector<32x4xi32>
    %59 = arith.muli %57, %58 : vector<32x4xi32>
    %60 = arith.cmpi slt, %51, %59 : vector<32x4xi32>
    %61 = arith.andi %55, %60 : vector<32x4xi1>
    %62 = arith.extui %61 : vector<32x4xi1> to vector<32x4xi32>
    %63 = arith.sitofp %62 : vector<32x4xi32> to vector<32x4xf32>
    %64 = tpu.iota {dimensions = array<i32: 0>} : vector<4x32xi32>
    %65 = tpu.iota {dimensions = array<i32: 1>} : vector<4x32xi32>
    %c8_i32_16 = arith.constant 8 : i32
    %66 = vector.broadcast %c8_i32_16 : i32 to vector<4x32xi32>
    %67 = arith.muli %64, %66 : vector<4x32xi32>
    %68 = arith.cmpi sge, %65, %67 : vector<4x32xi32>
    %c1_i32_17 = arith.constant 1 : i32
    %69 = vector.broadcast %c1_i32_17 : i32 to vector<4x32xi32>
    %70 = arith.addi %64, %69 : vector<4x32xi32>
    %c8_i32_18 = arith.constant 8 : i32
    %71 = vector.broadcast %c8_i32_18 : i32 to vector<4x32xi32>
    %72 = arith.muli %70, %71 : vector<4x32xi32>
    %73 = arith.cmpi slt, %65, %72 : vector<4x32xi32>
    %74 = arith.andi %68, %73 : vector<4x32xi1>
    %75 = arith.extui %74 : vector<4x32xi1> to vector<4x32xi32>
    %76 = arith.sitofp %75 : vector<4x32xi32> to vector<4x32xf32>
    %cst_19 = arith.constant dense<0.000000e+00> : vector<2x4xf32>
    %77 = tpu.matmul %50, %63, %cst_19 {dimension_numbers = #tpu.dot_dimension_numbers<[1], [0], [0], [1], [0, 0, 1, 1], [], []>} : vector<2x32xf32>, vector<32x4xf32>, vector<2x4xf32> -> vector<2x4xf32>
    %cst_20 = arith.constant 1.000000e-30 : f32
    %78 = vector.broadcast %cst_20 : f32 to vector<2x4xf32>
    %79 = arith.maximumf %77, %78 : vector<2x4xf32>
    %80 = tpu.reciprocal %79 {approx = true} : vector<2x4xf32> -> vector<2x4xf32>
    %81 = arith.mulf %45, %80 : vector<2x4xf32>
    %cst_21 = arith.constant dense<0.000000e+00> : vector<2x32xf32>
    %82 = tpu.matmul %81, %76, %cst_21 {dimension_numbers = #tpu.dot_dimension_numbers<[1], [0], [0], [1], [0, 0, 1, 1], [], []>} : vector<2x4xf32>, vector<4x32xf32>, vector<2x32xf32> -> vector<2x32xf32>
    %83 = arith.mulf %50, %82 : vector<2x32xf32>
    %c0_22 = arith.constant 0 : index
    %c0_23 = arith.constant 0 : index
    %84 = vector.load %arg7[%c0_22, %c0_23] : memref<32x32xf32, #tpu.memory_space<vmem>>, vector<32x32xf32>
    %cst_24 = arith.constant dense<0.000000e+00> : vector<2x32xf32>
    %85 = tpu.matmul %83, %84, %cst_24 {dimension_numbers = #tpu.dot_dimension_numbers<[1], [0], [0], [1], [0, 0, 1, 1], [], []>} : vector<2x32xf32>, vector<32x32xf32>, vector<2x32xf32> -> vector<2x32xf32>
    %c0_25 = arith.constant 0 : index
    %c0_26 = arith.constant 0 : index
    %86 = vector.load %arg8[%c0_25, %c0_26] : memref<1x32xf32, #tpu.memory_space<vmem>>, vector<1x32xf32>
    %87 = vector.broadcast %86 : vector<1x32xf32> to vector<2x32xf32>
    %88 = arith.addf %85, %87 : vector<2x32xf32>
    %c0_27 = arith.constant 0 : index
    %c0_28 = arith.constant 0 : index
    %89 = vector.load %arg4[%c0_27, %c0_28] : memref<32x32xf32, #tpu.memory_space<vmem>>, vector<32x32xf32>
    %cst_29 = arith.constant dense<0.000000e+00> : vector<2x32xf32>
    %90 = tpu.matmul %88, %89, %cst_29 {dimension_numbers = #tpu.dot_dimension_numbers<[1], [0], [0], [1], [0, 0, 1, 1], [], []>} : vector<2x32xf32>, vector<32x32xf32>, vector<2x32xf32> -> vector<2x32xf32>
    %c0_30 = arith.constant 0 : index
    %c0_31 = arith.constant 0 : index
    %91 = vector.load %arg5[%c0_30, %c0_31] : memref<32x128xf32, #tpu.memory_space<vmem>>, vector<32x128xf32>
    %cst_32 = arith.constant dense<0.000000e+00> : vector<2x128xf32>
    %92 = tpu.matmul %90, %91, %cst_32 {dimension_numbers = #tpu.dot_dimension_numbers<[1], [0], [0], [1], [0, 0, 1, 1], [], []>} : vector<2x32xf32>, vector<32x128xf32>, vector<2x128xf32> -> vector<2x128xf32>
    %c0_33 = arith.constant 0 : index
    %c0_34 = arith.constant 0 : index
    %93 = vector.load %arg6[%c0_33, %c0_34] : memref<1x128xf32, #tpu.memory_space<vmem>>, vector<1x128xf32>
    %94 = vector.broadcast %93 : vector<1x128xf32> to vector<2x128xf32>
    %95 = arith.addf %92, %94 : vector<2x128xf32>
    %cst_35 = arith.constant dense<0xFF800000> : vector<2xf32>
    %96 = vector.multi_reduction <maximumf>, %95, %cst_35 [1] : vector<2x128xf32> to vector<2xf32>
    %97 = vector.shape_cast %96 : vector<2xf32> to vector<2x1xf32>
    %98 = vector.broadcast %97 : vector<2x1xf32> to vector<2x128xf32>
    %99 = arith.subf %95, %98 : vector<2x128xf32>
    %100 = math.exp %99 : vector<2x128xf32>
    %cst_36 = arith.constant dense<0.000000e+00> : vector<2xf32>
    %101 = vector.multi_reduction <add>, %100, %cst_36 [1] : vector<2x128xf32> to vector<2xf32>
    %102 = vector.shape_cast %101 : vector<2xf32> to vector<2x1xf32>
    %103 = math.log %102 : vector<2x1xf32>
    %104 = vector.broadcast %103 : vector<2x1xf32> to vector<2x128xf32>
    %105 = arith.subf %99, %104 : vector<2x128xf32>
    %c0_37 = arith.constant 0 : index
    %c0_38 = arith.constant 0 : index
    %106 = vector.load %arg9[%c0_37, %c0_38] : memref<2x128xf32, #tpu.memory_space<vmem>>, vector<2x128xf32>
    tpu.vector_store %arg9[%c0_37, %c0_38], %105 {strides = array<i32>} : memref<2x128xf32, #tpu.memory_space<vmem>>, vector<2x128xf32>,
    %cst_39 = arith.constant 0.000000e+00 : f32
    %107 = vector.broadcast %cst_39 : f32 to vector<2x32xf32>
    %108 = tpu.concatenate %31, %29, %88, %107 in 1 : vector<2x32xf32>, vector<2x32xf32>, vector<2x32xf32>, vector<2x32xf32> -> vector<2x128xf32>
    %c0_40 = arith.constant 0 : index
    %c0_41 = arith.constant 0 : index
    %109 = vector.load %arg10[%c0_40, %c0_41] : memref<2x128xf32, #tpu.memory_space<vmem>>, vector<2x128xf32>
    tpu.vector_store %arg10[%c0_40, %c0_41], %108 {strides = array<i32>} : memref<2x128xf32, #tpu.memory_space<vmem>>, vector<2x128xf32>,
    return
  }
}

</mosaic_0001>

<bundles_post_ra>
// kernel: hier_attn_decoder.1
= control target key start
LH: loop header
LB: loop body
LE: loop exit
PB: predicated region body
PF: predicated region fallthrough
CT: control target
= control target key end

     0   :  { %v970_v3 = vmov 0.0|0.0   ;;  %vm971_vm0 = vmmov 0   ;;  %v972_v6 = vmov 0.0   ;;  %s1185_s0 = inlined_call_operand.vmem [shape: f32[2,96], index: 0, kind: input, shape index: {}]   ;;  %s1186_s1 = inlined_call_operand.vmem [shape: f32[64,128], index: 1, kind: input, shape index: {}]   ;;  %s1187_s2 = inlined_call_operand.vmem [shape: f32[1,128], index: 2, kind: input, shape index: {}]   ;;  %s1188_s3 = inlined_call_operand.vmem [shape: f32[32,40], index: 3, kind: input, shape index: {}]   ;;  %s1189_s4 = inlined_call_operand.vmem [shape: f32[32,32], index: 4, kind: input, shape index: {}]   ;;  %s1190_s5 = inlined_call_operand.vmem [shape: f32[32,128], index: 5, kind: input, shape index: {}]   ;;  %s1191_s6 = inlined_call_operand.vmem [shape: f32[1,128], index: 6, kind: input, shape index: {}]   ;;  %s1192_s7 = inlined_call_operand.vmem [shape: f32[32,32], index: 7, kind: input, shape index: {}]   ;;  %s1193_s8 = inlined_call_operand.vmem [shape: f32[1,32], index: 8, kind: input, shape index: {}]   ;;  %s1194_s9 = inlined_call_operand.hbm [shape: f32[2,128], index: 9, kind: output, shape index: {0}]   ;;  %s1195_s10 = inlined_call_operand.vmem [shape: f32[2,128], index: 10, kind: output, shape index: {1}]  }
   0x1   :  { %v36_v0 = vld [vmem:[%s1186_s1] sm:$0xff]  ;;  %v37_v1 = vld [vmem:[%s1186_s1 + $0x8] sm:$0xff]  ;;  %v38_v2 = vld [vmem:[%s1186_s1 + $0x10] sm:$0xff]  ;;  %874 = vmatprep.subr.bf16.mxu0 %v970_v3  ;;  %811 = vmatprep.mubr.msk.f32.mxu0 %vm971_vm0, %v972_v6 }
   0x2   :  { %v875_v4 = vpack.c.bf16 %v37_v1, %v36_v0  ;;  %v39_v5 = vld [vmem:[%s1186_s1 + $0x18] sm:$0xff]  ;;  %886 = vmatprep.subr.bf16.mxu1 %v970_v3  ;;  %822 = vmatprep.mubr.msk.f32.mxu1 %vm971_vm0, %v972_v6 }
   0x3   :  { %v878_v7 = vpack.c.bf16 %v39_v5, %v38_v2 }
   0x4   :  { %876 = vmatpush3.bf16.msra.mxu0 %v875_v4 }
   0x5   :  { %16 = vsyncpa [#allocation3], 0  ;;  %877 = vmatprep.subr.bf16.mxu0 %v970_v3  ;;  %v40_v8 = vld [vmem:[%s1186_s1 + $0x20] sm:$0xff]  ;;  %v41_v9 = vld [vmem:[%s1186_s1 + $0x28] sm:$0xff]  ;;  %vm1196_vm1 = vcmask 523264   ;;  %s975_s13 = smov 32   ;;  %v251_v43 = vlaneseq }
   0x6   :  { %v881_v10 = vpack.c.bf16 %v41_v9, %v40_v8  ;;  %v42_v11 = vld [vmem:[%s1186_s1 + $0x30] sm:$0xff]  ;;  %v43_v12 = vld [vmem:[%s1186_s1 + $0x38] sm:$0xff]  ;;  %v35_v14 = vld [vmem:[%s1185_s0] sm:$0x3]  ;;  %s973_s1 = smov 64   ;;  %s974_s0 = smov 96  }
   0x7   :  { %v884_v13 = vpack.c.bf16 %v43_v12, %v42_v11  ;;  %v738_v15 = vld [vmem:[%s1187_s2] ss:$0 sm:$0xff]  ;;  %v153_v31 = vld [vmem:[%s1188_s3 + $0x8] sm:$0xff]  ;;  %v154_v32 = vld [vmem:[%s1188_s3 + $0x10] sm:$0xff]  ;;  %vm159_vm2 = vcmask 261120   ;;  %vm244_vm3 = vcmask 320576  }
   0x8   :  { %879 = vmatpush3.bf16.msra.mxu0 %v878_v7  ;;  %v152_v30 = vld [vmem:[%s1188_s3] sm:$0xff]  ;;  %v155_v34 = vld [vmem:[%s1188_s3 + $0x18] sm:$0xff]  ;;  %v252_v44 = vshrl.u32 %v251_v43, 7  ;;  %v257_v45 = vand.u32 127, %v251_v43  ;;  %v976_v52 = vmov 1.0|1.0  }
   0x9   :  { %880 = vmatprep.subr.bf16.mxu0 %v970_v3  ;;  %v887_v33 = vpack.c.bf16 %v153_v31, %v152_v30  ;;  %v890_v35 = vpack.c.bf16 %v155_v34, %v154_v32  ;;  %s977_s3 = smov 120   ;;  %s978_s29 = smov 8   ;;  %v539_v30 = vld [vmem:[%s1189_s4 + $0x18] sm:$0xff]  ;;  %v613_v32 = vld [vmem:[%s1190_s5] sm:$0xff] }
   0xa   :  { %v253_v46 = vadd.s32 8, %v252_v44  ;;  %v258_v47 = vmul.u32 8, %v257_v45  ;;  %v263_v48 = vadd.s32 1, %v257_v45  ;;  %v254_v49 = vadd.s32 16, %v252_v44  ;;  %s979_s24 = smov [#allocation2]  }
   0xb   :  { %888 = vmatpush3.bf16.msra.mxu1 %v887_v33  ;;  %v255_v51 = vadd.s32 24, %v252_v44  ;;  %v283_v0 = vadd.s32 1, %v252_v44  ;;  %v281_v1 = vmul.u32 8, %v252_v44  ;;  %v614_v33 = vld [vmem:[%s1190_s5 + $0x8] sm:$0xff]  ;;  %s726_s25 = sshll.u32 %s979_s24, 4  ;;  %s727_s25 = int_to_ptr.vmem [resolvable:$true] %s726_s25 }
   0xc   :  { %882 = vmatpush3.bf16.msra.mxu0 %v881_v10  ;;  %889 = vmatprep.subr.bf16.mxu1 %v970_v3  ;;  %vm259_vm4 = vcmp.ge.s32.totalorder %v252_v44, %v258_v47  ;;  %v264_v50 = vmul.u32 8, %v263_v48  ;;  %vm260_vm5 = vcmp.ge.s32.totalorder %v253_v46, %v258_v47  ;;  %vm261_vm9 = vcmp.ge.s32.totalorder %v254_v49, %v258_v47  ;;  %p951_p1 = scmp.lt.s32.totalorder %s727_s25, %s727_s25 }
   0xd   :  { %883 = vmatprep.subr.bf16.mxu0 %v970_v3  ;;  %vm262_vm12 = vcmp.ge.s32.totalorder %v255_v51, %v258_v47  ;;  %v284_v2 = vmul.u32 8, %v283_v0  ;;  %v911_v34 = vpack.c.bf16 %v614_v33, %v613_v32 }
   0xe   :  { %vm265_vm6 = vcmp.lt.s32.totalorder %v252_v44, %v264_v50  ;;  %vm266_vm7 = vcmp.lt.s32.totalorder %v253_v46, %v264_v50  ;;  %vm267_vm10 = vcmp.lt.s32.totalorder %v254_v49, %v264_v50  ;;  %vm268_vm13 = vcmp.lt.s32.totalorder %v255_v51, %v264_v50  ;;  %v757_v44 = vld [vmem:[%s1191_s6] ss:$0 sm:$0xff] }
   0xf   :  { %891 = vmatpush3.bf16.msra.mxu1 %v890_v35  ;;  %vm269_vm8 = vmand %vm259_vm4, %vm265_vm6  ;;  %vm232_vm4 = vcmask 25600   ;;  %vm371_vm6 = vcmask 1043456   ;;  %v616_v35 = vld [vmem:[%s1190_s5 + $0x18] sm:$0xff] }
  0x10   :  { %885 = vmatpush3.bf16.msra.mxu0 %v884_v13  ;;  %892 = vmatprep.subr.bf16.mxu1 %v970_v3  ;;  %vm270_vm11 = vmand %vm260_vm5, %vm266_vm7  ;;  %vm285_vm5 = vcmp.lt.s32.totalorder %v257_v45, %v284_v2 }
  0x11   :  { %836 = vmatprep.subr.mxu0 %v972_v6  ;;  %vm893_vm14 = vmpackc.low %vm270_vm11, %vm269_vm8  ;;  %vm367_vm8 = vcmask 31744  }
  0x12   :  { %vm271_vm15 = vmand %vm261_vm9, %vm267_vm10  ;;  %vm717_vm9 = vcmask 785408   ;;  %vm1197_vm10 = vcmask 523264  }
  0x13   :  { %812 = vmatmul.mubr.msk.f32.vlgmr.msra.gmra.mrb[0].mxu0 %vm1196_vm1, %v35_v14 }
  0x14   :  { %838 = vmatprep.mubr.msk.f32.mxu0 %vm971_vm0, %v972_v6 }
  0xe6   :  { %v121_v16 = vpop.f32.mrb[0].mxu0 }
  0xe7   :  { %v122_v17 = vadd.f32 %v738_v15, %v121_v16  ;;  %v813_v18 = vpop.f32.mrb[1].mxu0  ;;  %v451_v15 = vld [vmem:[%s1192_s7 + $0x8] sm:$0xff]  ;;  %v452_v16 = vld [vmem:[%s1192_s7 + $0x10] sm:$0xff] }
  0xe8   :  { %v453_v18 = vld [vmem:[%s1192_s7 + $0x18] sm:$0xff] }
  0xe9   :  { %926 = vtanh.f32 %v122_v17  ;;  %v740_v20 = vmul.f32 -1.442695, %v122_v17 }
  0xeb   :  { %928 = vpow2.f32 %v740_v20 }
  0xf3   :  { %v927_v19 = vpop.eup %926 }
  0xf4   :  { %137 = vrot.lane.b32.xlu0 %v927_v19, %s973_s1  ;;  %v902_v19 = vpack.c.bf16 %v453_v18, %v452_v16 }
  0xf5   :  { %v929_v21 = vpop.eup %928 }
  0xf6   :  { %v128_v22 = vadd.f32 1.0, %v929_v21 }
  0xf8   :  { %132 = vrot.lane.b32.xlu0 %v35_v14, %s974_s0  ;;  %930 = vrcp.f32 %v128_v22  ;;  %v450_v14 = vld [vmem:[%s1192_s7] sm:$0xff] }
  0xf9   :  { %v899_v17 = vpack.c.bf16 %v451_v15, %v450_v14  ;;  %v536_v22 = vld [vmem:[%s1189_s4] sm:$0xff] }
 0x102   :  { %v931_v23 = vpop.eup %930 }
 0x166   :  { %v138_v24 = vpop.permute.xlu0 %137 }
 0x167   :  { %v140_v25 = vmul.f32 %v931_v23, %v138_v24 }
 0x169   :  { %142 = vrot.lane.b32.xlu1 %v140_v25, %s975_s13 }
 0x16a   :  { %v133_v26 = vpop.permute.xlu0 %132 }
 0x16b   :  { %v135_v27 = vmul.f32 %v931_v23, %v133_v26 }
 0x1db   :  { %v143_v28 = vpop.permute.xlu1 %142 }
 0x1dc   :  { %v1079_v29 = vadd.f32 %v143_v28, %v135_v27  ;;  %v538_v28 = vld [vmem:[%s1189_s4 + $0x10] sm:$0xff] }
 0x1dd   :  { %v908_v31 = vpack.c.bf16 %v539_v30, %v538_v28 }
 0x1de   :  { %932 = vtanh.f32 %v1079_v29 }
 0x1e8   :  { %v933_v36 = vpop.eup %932 }
 0x1e9   :  { %148 = vrot.lane.b32.xlu1 %v933_v36, %s973_s1 }
 0x25b   :  { %v149_v37 = vpop.permute.xlu1 %148 }
 0x25c   :  { %v151_v38 = vmul.f32 %v931_v23, %v149_v37  ;;  %v537_v23 = vld [vmem:[%s1189_s4 + $0x8] sm:$0xff]  ;;  %v754_v37 = vld [vmem:[%s1193_s8] ss:$0 sm:$0xff] }
 0x25d   :  { %v905_v24 = vpack.c.bf16 %v537_v23, %v536_v22 }
 0x25e   :  { %157 = vrot.lane.b32.xlu0 %v151_v38, %s975_s13 }
 0x2d0   :  { %v1097_v39 = vpop.permute.xlu0 %157 }
 0x2d1   :  { %823 = vmatmul.mubr.msk.f32.vlgmr.msra.gmra.mrb[0].mxu1 %vm159_vm2, %v1097_v39 }
 0x2d2   :  { %833 = vmatprep.mubr.msk.f32.mxu1 %vm971_vm0, %v972_v6  ;;  %894 = vmatpush3.bf16.msk.msra.mxu1 %vm893_vm14, %v976_v52 }
 0x2d3   :  { %895 = vmatprep.subr.bf16.mxu1 %v970_v3 }
 0x3a4   :  { %v228_v40 = vpop.f32.mrb[0].mxu1 }
 0x3a5   :  { %v824_v41 = vpop.f32.mrb[1].mxu1  ;;  %v245_v42 = vsel %vm244_vm3, %v228_v40, -inf  ;;  %vm272_vm3 = vmand %vm262_vm12, %vm268_vm13  ;;  %v233_v57 = vsel %vm232_vm4, %v228_v40, -inf }
 0x3a6   :  { %246 = vmax.xlane.f32.xlu1 %v245_v42  ;;  %vm896_vm1 = vmpackc.low %vm272_vm3, %vm271_vm15 }
 0x3a7   :  { %897 = vmatpush3.bf16.msk.msra.mxu1 %vm896_vm1, %v976_v52  ;;  %vm282_vm1 = vcmp.ge.s32.totalorder %v257_v45, %v281_v1 }
 0x3a8   :  { %898 = vmatprep.subr.bf16.mxu1 %v970_v3  ;;  %vm286_vm7 = vmand %vm282_vm1, %vm285_vm5 }
 0x3a9   :  { %v746_v4 = vsel %vm286_vm7, 1.0, %v972_v6 }
 0x3aa   :  { %837 = vmatpush3.msk.msra.mxu0 %vm371_vm6, %v746_v4 }
 0x3ab   :  { %904 = vmatprep.subr.bf16.mxu0 %v970_v3 }
 0x433   :  { %v247_v53 = vpop.xlane.xlu1 %246 }
 0x434   :  { %v248_v54 = vsub.f32 %v228_v40, %v247_v53 }
 0x436   :  { %v249_v55 = vmul.f32 1.442695, %v248_v54  ;;  %v715_v54 = vsel %vm159_vm2, %v1097_v39, %v1079_v29 }
 0x438   :  { %934 = vpow2.f32 %v249_v55 }
 0x442   :  { %v935_v56 = vpop.eup %934 }
 0x443   :  { %290 = vrot.lane.b32.xlu0 %v935_v56, %s977_s3 }
 0x462   :  { %234 = vmax.xlane.f32.xlu0 %v233_v57 }
 0x4b5   :  { %v291_v58 = vpop.permute.xlu0 %290 }
 0x4b6   :  { %834 = vmatmul.mubr.msk.f32.vlgmr.msra.gmra.mrb[2].mxu1 %vm159_vm2, %v291_v58 }
 0x4b7   :  { %849 = vmatprep.mubr.msk.f32.mxu1 %vm971_vm0, %v972_v6  ;;  %900 = vmatpush3.bf16.msra.mxu1 %v899_v17 }
 0x4b8   :  { %901 = vmatprep.subr.bf16.mxu1 %v970_v3 }
 0x4bb   :  { %903 = vmatpush3.bf16.msra.mxu1 %v902_v19 }
 0x4bc   :  { %910 = vmatprep.subr.bf16.mxu1 %v970_v3 }
 0x4ef   :  { %v235_v59 = vpop.xlane.xlu0 %234 }
 0x4f0   :  { %v236_v60 = vsub.f32 %v228_v40, %v235_v59 }
 0x4f2   :  { %v237_v61 = vmul.f32 1.442695, %v236_v60 }
 0x4f4   :  { %936 = vpow2.f32 %v237_v61 }
 0x4fe   :  { %v937_v62 = vpop.eup %936 }
 0x4ff   :  { %v239_v63 = vsel %vm232_vm4, %v937_v62, 0.0 }
 0x500   :  { %240 = vadd.xlane.f32.xlu1 %v239_v63 }
 0x589   :  { %v360_v5 = vpop.f32.mrb[2].mxu1 }
 0x58a   :  { %v835_v7 = vpop.f32.mrb[3].mxu1  ;;  %v364_v8 = vmax.f32 %v360_v5, 1e-30 }
 0x58d   :  { %v241_v9 = vpop.xlane.xlu1 %240 }
 0x58e   :  { %938 = vrcp.f32 %v241_v9 }
 0x58f   :  { %940 = vrcp.f32 %v364_v8 }
 0x598   :  { %v939_v10 = vpop.eup %938 }
 0x599   :  { %v243_v11 = vmul.f32 %v939_v10, %v937_v62  ;;  %v941_v12 = vpop.eup %940 }
 0x59b   :  { %v366_v13 = vmul.f32 %v941_v12, %v243_v11 }
 0x59d   :  { %839 = vmatmul.mubr.msk.f32.vlgmr.msra.gmra.mrb[2].mxu0 %vm367_vm8, %v366_v13 }
 0x59e   :  { %860 = vmatprep.mubr.msk.f32.mxu0 %vm971_vm0, %v972_v6  ;;  %906 = vmatpush3.bf16.msra.mxu0 %v905_v24 }
 0x59f   :  { %907 = vmatprep.subr.bf16.mxu0 %v970_v3 }
 0x5a2   :  { %909 = vmatpush3.bf16.msra.mxu0 %v908_v31 }
 0x670   :  { %v441_v20 = vpop.f32.mrb[2].mxu0 }
 0x671   :  { %446 = vrot.lane.b32.xlu0 %v441_v20, %s978_s29  ;;  %v840_v21 = vpop.f32.mrb[3].mxu0 }
 0x6e3   :  { %v447_v25 = vpop.permute.xlu0 %446 }
 0x6e4   :  { %v449_v26 = vmul.f32 %v935_v56, %v447_v25 }
 0x6e6   :  { %462 = vrot.lane.b32.xlu1 %v449_v26, %s977_s3 }
 0x758   :  { %v463_v27 = vpop.permute.xlu1 %462 }
 0x759   :  { %850 = vmatmul.mubr.msk.f32.vlgmr.msra.gmra.mrb[4].mxu1 %vm159_vm2, %v463_v27 }
 0x75a   :  { %871 = vmatprep.mubr.msk.f32.mxu1 %vm971_vm0, %v972_v6  ;;  %v615_v6 = vld [vmem:[%s1190_s5 + $0x10] sm:$0xff]  ;;  %912 = vmatpush3.bf16.msra.mxu1 %v911_v34  ;;  %vm697_vm0 = vcmask 1041408  }
 0x75b   :  { %v914_v36 = vpack.c.bf16 %v616_v35, %v615_v6  ;;  %913 = vmatprep.subr.bf16.mxu1 %v970_v3 }
 0x75e   :  { %915 = vmatpush3.bf16.msra.mxu1 %v914_v36 }
 0x82c   :  { %v532_v38 = vpop.f32.mrb[4].mxu1 }
 0x82d   :  { %v533_v40 = vadd.f32 %v754_v37, %v532_v38  ;;  %v851_v41 = vpop.f32.mrb[5].mxu1 }
 0x82f   :  { %861 = vmatmul.mubr.msk.f32.vlgmr.msra.gmra.mrb[4].mxu0 %vm159_vm2, %v533_v40 }
 0x902   :  { %v609_v42 = vpop.f32.mrb[4].mxu0 }
 0x903   :  { %v862_v43 = vpop.f32.mrb[5].mxu0  ;;  %872 = vmatmul.mubr.msk.f32.vlgmr.msra.gmra.mrb[6].mxu1 %vm159_vm2, %v609_v42 }
 0x9d6   :  { %v693_v45 = vpop.f32.mrb[6].mxu1 }
 0x9d7   :  { %v694_v3 = vadd.f32 %v757_v44, %v693_v45  ;;  %v873_v46 = vpop.f32.mrb[7].mxu1 }
 0x9d9   :  { %v698_v47 = vsel %vm697_vm0, %v694_v3, -inf }
 0x9da   :  { %699 = vmax.xlane.f32.xlu1 %v698_v47 }
 0xa67   :  { %v700_v48 = vpop.xlane.xlu1 %699 }
 0xa68   :  { %v701_v49 = vsub.f32 %v694_v3, %v700_v48 }
 0xa6a   :  { %v702_v50 = vmul.f32 1.442695, %v701_v49 }
 0xa6c   :  { %942 = vpow2.f32 %v702_v50 }
 0xa76   :  { %v943_v51 = vpop.eup %942 }
 0xa77   :  { %v704_v52 = vsel %vm697_vm0, %v943_v51, 0.0 }
 0xa78   :  { %705 = vadd.xlane.f32.xlu0 %v704_v52 }
 0xa8e   :  { %712 = vrot.lane.b32.xlu0 %v533_v40, %s973_s1  ;;  %s946_s1 = scalar_lea.vmem %s727_s25, 32 }
 0xa8f   :  { %p947_p0 = scmp.ne.s32.totalorder %s727_s25, %s946_s1  ;;  %p952_p2 = scmp.lt.s32.totalorder %s946_s1, %s946_s1 }
 0xa91   :  { %p953_p3 = por %p952_p2, %p951_p1 }
 0xa93   :  { %p954_p4 = pnand %p953_p3, %p947_p0 }
 0xb05   :  { %v706_v53 = vpop.xlane.xlu0 %705 }
 0xb06   :  { %944 = vlog2.f32 %v706_v53 }
 0xb09   :  { %v713_v55 = vpop.permute.xlu0 %712 }
 0xb0a   :  { %v716_v56 = vsel %vm1197_vm10, %v715_v54, %v713_v55 }
 0xb0b   :  { %v718_v57 = vsel %vm717_vm9, %v716_v56, 0.0 }
 0xb0c   :  { %719 = vst [vmem:[%s1195_s10] sm:$0x3] %v718_v57 }
 0xb10   :  { %v945_v58 = vpop.eup %944 }
 0xb11   :  { %v708_v59 = vmul.f32 0.6931472, %v945_v58 }
 0xb13   :  { %v709_v60 = vsub.f32 %v701_v49, %v708_v59 }
 0xb15   :  { %710 = vst [vmem:[#allocation2] sm:$0x3] %v709_v60 }
 0xb16   :  { %957 = shalt.err (!%p954_p4)
}
 0xb17   :  { %s958_s28 = scalar_lea.hbm %s1194_s9, 32 }
 0xb18   :  { %p959_p5 = scmp.ne.s32.totalorder %s1194_s9, %s958_s28  ;;  %p962_p6 = scmp.lt.u32.totalorder %s958_s28, %s1194_s9 }
 0xb1a   :  { %p964_p7 = pnand %p962_p6, %p959_p5 }
 0xb1c   :  { %967 = shalt.err (!%p964_p7)
}
 0xb1d   :  { %729 = dma.vmem_to_hbm [thread:$0]  %s727_s25, 32, %s1194_s9, [#allocation3]  }
 0xb1e   :  { %968 = dma.done.wait [#allocation3], 32  }
 0xb1f   :  { %969 = vsyncadd [#allocation3], 4294967264 }
 0xb20   :  { %737 = vsyncpa [#allocation3], 1 }

</bundles_post_ra>
